<compile_context>
chip_gen: v7x
topology: tpu7x:2x2x1
jax: 0.10.0
libtpu: 0.0.40
codegen_flags: <defaults>
</compile_context>

<pallas_src>
import functools

import jax
import jax.numpy as jnp
from jax import lax
from jax.experimental import pallas as pl
from jax.experimental.pallas import tpu as pltpu

HIDDEN = 32  # fixed by the module definition (hyper nets emit 32-wide hidden)

# dot_general dimension numbers: contract the last (lane) dim of both operands
# -> out[f, b] = sum_k lhs[f, k] * rhs[b, k]   (MXU-friendly "NT" matmul).
_DN = (((1,), (1,)), ((), ()))


def _round_up(x, m):
    return ((x + m - 1) // m) * m


def _num_tensorcores():
    """1 TensorCore on v5e/v6e, 2 on v7x (crude but safe device_kind check)."""
    try:
        kind = jax.devices()[0].device_kind.lower()
    except Exception:
        return 1
    return 2 if "7" in kind else 1


def _plan(B, n_cores):
    """Pick (n_tiles, TB, padded_B).

    - single tile on 1-TC chips for mid-size B (per-grid-step overhead ~0.35us
      dominates this kernel's per-tile work),
    - >= n_cores tiles only when there are multiple TensorCores and B is big
      enough to be worth splitting,
    - TB capped at 2048 (VMEM-safe on all generations with the raised limit),
    - multi-tile output blocks are kept 128-lane aligned; tiny B is padded up
      to one 128-lane tile so the (1, TB) store stays lane-dense.
    """
    TB_MAX = 2048
    min_tiles = n_cores if B >= 256 * n_cores else 1
    n_tiles = max(min_tiles, (B + TB_MAX - 1) // TB_MAX)
    tb = _round_up((B + n_tiles - 1) // n_tiles, 8)
    if n_tiles > 1:
        tb = _round_up(tb, 128)
    elif tb < 128:
        tb = 128
    return n_tiles, tb, n_tiles * tb


def _mixing_kernel(st_ref, qs_ref, ws_ref, r_ref, b_ref, vw2_ref, vb2_ref,
                   out_ref, *, n_agents, hidden):
    """Features on sublanes, batch on lanes.  One tile = TB batch rows."""
    A, H = n_agents, hidden
    AH = A * H

    st = st_ref[...].astype(jnp.float32)      # (TB, S)
    qs = qs_ref[...].astype(jnp.float32)      # (TB, A)

    # All four state-side hyper linears in ONE MXU matmul, output transposed
    # so every feature block lands on a 32-aligned sublane offset.
    # fused rows: [w1_raw (A*H) | b1 (H) | w2_raw (H) | vh_raw (H)]
    fused = lax.dot_general(ws_ref[...], st, _DN,
                            preferred_element_type=jnp.float32) + b_ref[...]

    # qs replicated per agent across the H hidden rows via a 0/1 matrix on the
    # MXU (no lane broadcasts / transposes): qs_rep[a*H + h, b] = qs[b, a].
    qs_rep = lax.dot_general(r_ref[...], qs, _DN,
                             preferred_element_type=jnp.float32)      # (A*H, TB)

    w1 = jnp.abs(fused[:AH])                          # (A*H, TB)
    b1 = fused[AH:AH + H]                             # (H, TB)
    w2 = jnp.abs(fused[AH + H:AH + 2 * H])            # (H, TB)
    vh = jnp.maximum(fused[AH + 2 * H:AH + 3 * H], 0.0)   # (H, TB)  V-head hidden

    # hidden = bmm(qs, w1) + b1  ->  aligned 32-row sublane-block adds.
    prod = qs_rep * w1                                # (A*H, TB)
    hid = b1
    for a in range(A):                                # small & static -> unrolled
        hid = hid + prod[a * H:(a + 1) * H]           # (H, TB)

    # y = bmm(hidden, w2) + V(states): both reductions share one sublane sum.
    z = hid * w2 + vh * vw2_ref[...]                  # (H, TB); vw2 is (H, 1)
    y = jnp.sum(z, axis=0, keepdims=True) + vb2_ref[...]   # (1, TB) lane-dense
    out_ref[...] = y.astype(out_ref.dtype)


def _pack_params(params, n_agents, state_dim):
    """Pack hyper-net weights for the transposed-layout kernel."""
    (Ww1, bw1, Wb1, bb1, Ww2, bw2, Vw1, Vb1, Vw2, Vb2) = params
    A, H = n_agents, HIDDEN

    # Feature-row order: [w1 (A*H) | b1 (H) | w2 (H) | vh (H)]  (all 32-aligned).
    Ws = jnp.concatenate([Ww1, Wb1, Ww2, Vw1], axis=1).T.astype(jnp.float32)   # (NF, S)
    b_all = jnp.concatenate([bw1, bb1, bw2, Vb1], axis=1).T.astype(jnp.float32)  # (NF, 1)

    # 0/1 repeat matrix: R[a*H + h, a] = 1.
    R = (jnp.arange(A * H)[:, None] // H == jnp.arange(A)[None, :]).astype(jnp.float32)

    vw2 = Vw2.reshape(H, 1).astype(jnp.float32)
    vb2 = Vb2.reshape(1, 1).astype(jnp.float32)
    return Ws, R, b_all, vw2, vb2


def mixing_network_forward(agent_qs, states, params, *, n_agents, state_dim):
    """agent_qs: (bs, ts, n_agents), states: (bs, ts, state_dim) -> (bs, ts, 1)."""
    bs, ts, _ = agent_qs.shape
    B = bs * ts
    A, S, H = n_agents, state_dim, HIDDEN

    st = states.reshape(B, S)
    qs = agent_qs.reshape(B, A)

    n_tiles, TB, Bp = _plan(B, _num_tensorcores())
    if Bp != B:
        # TODO(synk): ragged tails pay a small wrapper pad copy; masked partial
        # last blocks would avoid it but are kept off the hot path for robustness.
        st = jnp.pad(st, ((0, Bp - B), (0, 0)))
        qs = jnp.pad(qs, ((0, Bp - B), (0, 0)))

    Ws, R, b_all, vw2, vb2 = _pack_params(params, A, S)
    NF = Ws.shape[0]  # A*H + 3*H

    kernel = functools.partial(_mixing_kernel, n_agents=A, hidden=H)
    const = lambda shape: pl.BlockSpec(shape, lambda i: (0,) * len(shape))

    y = pl.pallas_call(
        kernel,
        out_shape=jax.ShapeDtypeStruct((1, Bp), jnp.float32),
        grid_spec=pltpu.PrefetchScalarGridSpec(
            num_scalar_prefetch=0,
            grid=(n_tiles,),
            in_specs=[
                pl.BlockSpec((TB, S), lambda i: (i, 0)),   # states tile
                pl.BlockSpec((TB, A), lambda i: (i, 0)),   # agent_qs tile
                const((NF, S)),                            # fused hyper weights (transposed)
                const((A * H, A)),                         # qs repeat matrix
                const((NF, 1)),                            # fused hyper biases (column)
                const((H, 1)),                             # V[2] weight (column)
                const((1, 1)),                             # V[2] bias
            ],
            out_specs=pl.BlockSpec((1, TB), lambda i: (0, i)),  # lane-dense row
        ),
        compiler_params=pltpu.CompilerParams(
            dimension_semantics=("parallel",),
            vmem_limit_bytes=32 * 1024 * 1024,
        ),
    )(st, qs, Ws, R, b_all, vw2, vb2)

    return y.reshape(Bp)[:B].reshape(bs, ts, 1)


def init_params(key, n_agents, state_dim):
    """Deterministic synthetic parameters with nn.Linear-like shapes (stored transposed)."""
    ks = jax.random.split(key, 10)
    u = lambda k, shape, fan_in: jax.random.uniform(
        k, shape, jnp.float32, -1.0 / jnp.sqrt(fan_in), 1.0 / jnp.sqrt(fan_in))
    S, A, H = state_dim, n_agents, HIDDEN
    return (
        u(ks[0], (S, A * H), S), u(ks[1], (1, A * H), S),   # hyper_w1
        u(ks[2], (S, H), S),     u(ks[3], (1, H), S),       # hyper_b1
        u(ks[4], (S, H), S),     u(ks[5], (1, H), S),       # hyper_w2
        u(ks[6], (S, H), S),     u(ks[7], (1, H), S),       # V[0]
        u(ks[8], (H, 1), H),     u(ks[9], (1, 1), H),       # V[2]
    )


def mixing_network_ref(agent_qs, states, params, *, n_agents, state_dim):
    """Pure-JAX reference mirroring the PyTorch forward exactly."""
    bs, ts, _ = agent_qs.shape
    B = bs * ts
    qs = agent_qs.reshape(B, n_agents).astype(jnp.float32)
    st = states.reshape(B, state_dim).astype(jnp.float32)
    (Ww1, bw1, Wb1, bb1, Ww2, bw2, Vw1, Vb1, Vw2, Vb2) = params
    w1 = jnp.abs(st @ Ww1 + bw1).reshape(B, n_agents, HIDDEN)
    b1 = (st @ Wb1 + bb1).reshape(B, 1, HIDDEN)
    hidden = jnp.einsum("ba,bah->bh", qs, w1)[:, None, :] + b1
    w2 = jnp.abs(st @ Ww2 + bw2).reshape(B, HIDDEN, 1)
    v = (jnp.maximum(st @ Vw1 + Vb1, 0.0) @ Vw2 + Vb2).reshape(B, 1, 1)
    y = jnp.einsum("bih,bhj->bij", hidden, w2) + v
    return y.reshape(bs, ts, 1)


if __name__ == "__main__":
    n_agents, state_dim = 4, 32
    key = jax.random.PRNGKey(0)
    k_qs, k_st, k_p, k_qs2, k_st2 = jax.random.split(key, 5)
    params = init_params(k_p, n_agents, state_dim)

    # Small shape (single 128-row padded tile, exact lane-dense store).
    bs, ts = 2, 8
    agent_qs = jax.random.normal(k_qs, (bs, ts, n_agents), jnp.float32)
    states = jax.random.normal(k_st, (bs, ts, state_dim), jnp.float32)
    out = jax.block_until_ready(
        mixing_network_forward(agent_qs, states, params,
                               n_agents=n_agents, state_dim=state_dim))
    ref = mixing_network_ref(agent_qs, states, params,
                             n_agents=n_agents, state_dim=state_dim)
    assert out.shape == (bs, ts, 1)
    assert jnp.allclose(out, ref, atol=1e-4, rtol=1e-4)

    # Larger shape: B = 400 -> single exact tile on 1-TC chips, two 256-row
    # tiles (with a small pad) on 2-TC chips.
    bs2, ts2 = 4, 100
    agent_qs2 = jax.random.normal(k_qs2, (bs2, ts2, n_agents), jnp.float32)
    states2 = jax.random.normal(k_st2, (bs2, ts2, state_dim), jnp.float32)
    out2 = jax.block_until_ready(
        mixing_network_forward(agent_qs2, states2, params,
                               n_agents=n_agents, state_dim=state_dim))
    ref2 = mixing_network_ref(agent_qs2, states2, params,
                              n_agents=n_agents, state_dim=state_dim)
    assert out2.shape == (bs2, ts2, 1)
    assert jnp.allclose(out2, ref2, atol=1e-4, rtol=1e-4)

    print("KERNEL_OK")
</pallas_src>

<mosaic_0001>
module attributes {stable_mosaic.version = 11 : i64} {
  func.func @_mixing_kernel(%arg0: i32, %arg1: memref<128x32xf32, #tpu.memory_space<vmem>>, %arg2: memref<128x4xf32, #tpu.memory_space<vmem>>, %arg3: memref<224x32xf32, #tpu.memory_space<vmem>>, %arg4: memref<128x4xf32, #tpu.memory_space<vmem>>, %arg5: memref<224x1xf32, #tpu.memory_space<vmem>>, %arg6: memref<32x1xf32, #tpu.memory_space<vmem>>, %arg7: memref<1x1xf32, #tpu.memory_space<vmem>>, %arg8: memref<1x128xf32, #tpu.memory_space<vmem>>) attributes {dimension_semantics = [#tpu.dimension_semantics<parallel>], iteration_bounds = array<i64: 1>, scalar_prefetch = 0 : i64, scratch_operands = 0 : i64, tpu.core_type = #tpu.core_type<tc>, window_params = [{transform_indices = @transform_0, window_bounds = array<i64: 128, 32>}, {transform_indices = @transform_1, window_bounds = array<i64: 128, 4>}, {pipeline_mode = #tpu.pipeline_mode<synchronous>, transform_indices = @transform_2, window_bounds = array<i64: 224, 32>}, {pipeline_mode = #tpu.pipeline_mode<synchronous>, transform_indices = @transform_3, window_bounds = array<i64: 128, 4>}, {pipeline_mode = #tpu.pipeline_mode<synchronous>, transform_indices = @transform_4, window_bounds = array<i64: 224, 1>}, {pipeline_mode = #tpu.pipeline_mode<synchronous>, transform_indices = @transform_5, window_bounds = array<i64: 32, 1>}, {pipeline_mode = #tpu.pipeline_mode<synchronous>, transform_indices = @transform_6, window_bounds = array<i64: 1, 1>}, {transform_indices = @transform_7, window_bounds = array<i64: 1, 128>}]} {
    %c0 = arith.constant 0 : index
    %c0_0 = arith.constant 0 : index
    %0 = vector.load %arg1[%c0, %c0_0] : memref<128x32xf32, #tpu.memory_space<vmem>>, vector<128x32xf32>
    %c0_1 = arith.constant 0 : index
    %c0_2 = arith.constant 0 : index
    %1 = vector.load %arg2[%c0_1, %c0_2] : memref<128x4xf32, #tpu.memory_space<vmem>>, vector<128x4xf32>
    %c0_3 = arith.constant 0 : index
    %c0_4 = arith.constant 0 : index
    %2 = vector.load %arg3[%c0_3, %c0_4] : memref<224x32xf32, #tpu.memory_space<vmem>>, vector<224x32xf32>
    %cst = arith.constant dense<0.000000e+00> : vector<224x128xf32>
    %3 = tpu.matmul %2, %0, %cst {dimension_numbers = #tpu.dot_dimension_numbers<[1], [1], [0], [0], [0, 0, 1, 0], [], []>} : vector<224x32xf32>, vector<128x32xf32>, vector<224x128xf32> -> vector<224x128xf32>
    %c0_5 = arith.constant 0 : index
    %c0_6 = arith.constant 0 : index
    %4 = vector.load %arg5[%c0_5, %c0_6] : memref<224x1xf32, #tpu.memory_space<vmem>>, vector<224x1xf32>
    %5 = vector.broadcast %4 : vector<224x1xf32> to vector<224x128xf32>
    %6 = arith.addf %3, %5 : vector<224x128xf32>
    %c0_7 = arith.constant 0 : index
    %c0_8 = arith.constant 0 : index
    %7 = vector.load %arg4[%c0_7, %c0_8] : memref<128x4xf32, #tpu.memory_space<vmem>>, vector<128x4xf32>
    %cst_9 = arith.constant dense<0.000000e+00> : vector<128x128xf32>
    %8 = tpu.matmul %7, %1, %cst_9 {dimension_numbers = #tpu.dot_dimension_numbers<[1], [1], [0], [0], [0, 0, 1, 0], [], []>} : vector<128x4xf32>, vector<128x4xf32>, vector<128x128xf32> -> vector<128x128xf32>
    %9 = vector.extract_strided_slice %6 {offsets = [0, 0], sizes = [128, 128], strides = [1, 1]} : vector<224x128xf32> to vector<128x128xf32>
    %10 = math.absf %9 : vector<128x128xf32>
    %11 = vector.extract_strided_slice %6 {offsets = [128, 0], sizes = [32, 128], strides = [1, 1]} : vector<224x128xf32> to vector<32x128xf32>
    %12 = vector.extract_strided_slice %6 {offsets = [160, 0], sizes = [32, 128], strides = [1, 1]} : vector<224x128xf32> to vector<32x128xf32>
    %13 = math.absf %12 : vector<32x128xf32>
    %14 = vector.extract_strided_slice %6 {offsets = [192, 0], sizes = [32, 128], strides = [1, 1]} : vector<224x128xf32> to vector<32x128xf32>
    %cst_10 = arith.constant 0.000000e+00 : f32
    %15 = vector.broadcast %cst_10 : f32 to vector<32x128xf32>
    %16 = arith.maximumf %14, %15 : vector<32x128xf32>
    %17 = arith.mulf %8, %10 : vector<128x128xf32>
    %18 = vector.extract_strided_slice %17 {offsets = [0, 0], sizes = [32, 128], strides = [1, 1]} : vector<128x128xf32> to vector<32x128xf32>
    %19 = arith.addf %11, %18 : vector<32x128xf32>
    %20 = vector.extract_strided_slice %17 {offsets = [32, 0], sizes = [32, 128], strides = [1, 1]} : vector<128x128xf32> to vector<32x128xf32>
    %21 = arith.addf %19, %20 : vector<32x128xf32>
    %22 = vector.extract_strided_slice %17 {offsets = [64, 0], sizes = [32, 128], strides = [1, 1]} : vector<128x128xf32> to vector<32x128xf32>
    %23 = arith.addf %21, %22 : vector<32x128xf32>
    %24 = vector.extract_strided_slice %17 {offsets = [96, 0], sizes = [32, 128], strides = [1, 1]} : vector<128x128xf32> to vector<32x128xf32>
    %25 = arith.addf %23, %24 : vector<32x128xf32>
    %26 = arith.mulf %25, %13 : vector<32x128xf32>
    %c0_11 = arith.constant 0 : index
    %c0_12 = arith.constant 0 : index
    %27 = vector.load %arg6[%c0_11, %c0_12] : memref<32x1xf32, #tpu.memory_space<vmem>>, vector<32x1xf32>
    %28 = vector.broadcast %27 : vector<32x1xf32> to vector<32x128xf32>
    %29 = arith.mulf %16, %28 : vector<32x128xf32>
    %30 = arith.addf %26, %29 : vector<32x128xf32>
    %cst_13 = arith.constant dense<0.000000e+00> : vector<128xf32>
    %31 = vector.multi_reduction <add>, %30, %cst_13 [0] : vector<32x128xf32> to vector<128xf32>
    %32 = vector.shape_cast %31 : vector<128xf32> to vector<1x128xf32>
    %c0_14 = arith.constant 0 : index
    %c0_15 = arith.constant 0 : index
    %33 = vector.load %arg7[%c0_14, %c0_15] : memref<1x1xf32, #tpu.memory_space<vmem>>, vector<1x1xf32>
    %34 = vector.broadcast %33 : vector<1x1xf32> to vector<1x128xf32>
    %35 = arith.addf %32, %34 : vector<1x128xf32>
    %c0_16 = arith.constant 0 : index
    %c0_17 = arith.constant 0 : index
    %36 = vector.load %arg8[%c0_16, %c0_17] : memref<1x128xf32, #tpu.memory_space<vmem>>, vector<1x128xf32>
    tpu.vector_store %arg8[%c0_16, %c0_17], %35 {strides = array<i32>} : memref<1x128xf32, #tpu.memory_space<vmem>>, vector<1x128xf32>,
    return
  }
  func.func @transform_0(%arg0: i32) -> (i32, i32) {
    %c0_i32 = arith.constant 0 : i32
    %c0_i32_0 = arith.constant 0 : i32
    return %arg0, %c0_i32 : i32, i32
  }
  func.func @transform_1(%arg0: i32) -> (i32, i32) {
    %c0_i32 = arith.constant 0 : i32
    %c0_i32_0 = arith.constant 0 : i32
    return %arg0, %c0_i32 : i32, i32
  }
  func.func @transform_2(%arg0: i32) -> (i32, i32) {
    %c0_i32 = arith.constant 0 : i32
    %c0_i32_0 = arith.constant 0 : i32
    %c0_i32_1 = arith.constant 0 : i32
    return %c0_i32, %c0_i32_0 : i32, i32
  }
  func.func @transform_3(%arg0: i32) -> (i32, i32) {
    %c0_i32 = arith.constant 0 : i32
    %c0_i32_0 = arith.constant 0 : i32
    %c0_i32_1 = arith.constant 0 : i32
    return %c0_i32, %c0_i32_0 : i32, i32
  }
  func.func @transform_4(%arg0: i32) -> (i32, i32) {
    %c0_i32 = arith.constant 0 : i32
    %c0_i32_0 = arith.constant 0 : i32
    %c0_i32_1 = arith.constant 0 : i32
    return %c0_i32, %c0_i32_0 : i32, i32
  }
  func.func @transform_5(%arg0: i32) -> (i32, i32) {
    %c0_i32 = arith.constant 0 : i32
    %c0_i32_0 = arith.constant 0 : i32
    %c0_i32_1 = arith.constant 0 : i32
    return %c0_i32, %c0_i32_0 : i32, i32
  }
  func.func @transform_6(%arg0: i32) -> (i32, i32) {
    %c0_i32 = arith.constant 0 : i32
    %c0_i32_0 = arith.constant 0 : i32
    %c0_i32_1 = arith.constant 0 : i32
    return %c0_i32, %c0_i32_0 : i32, i32
  }
  func.func @transform_7(%arg0: i32) -> (i32, i32) {
    %c0_i32 = arith.constant 0 : i32
    %c0_i32_0 = arith.constant 0 : i32
    return %c0_i32, %arg0 : i32, i32
  }
}

</mosaic_0001>

<bundles_post_ra>
// kernel: tpu_custom_call.1
= control target key start
LH: loop header
LB: loop body
LE: loop exit
PB: predicated region body
PF: predicated region fallthrough
CT: control target
= control target key end

     0   :  { %s1923_s0 = inlined_call_operand.vmem [shape: f32[128,32], index: 0, kind: input, shape index: {}]   ;;  %s1924_s1 = inlined_call_operand.vmem [shape: f32[128,4], index: 1, kind: input, shape index: {}]   ;;  %s1925_s2 = inlined_call_operand.vmem [shape: f32[224,32], index: 2, kind: input, shape index: {}]   ;;  %s1926_s3 = inlined_call_operand.vmem [shape: f32[128,4], index: 3, kind: input, shape index: {}]   ;;  %s1927_s4 = inlined_call_operand.vmem [shape: f32[224,1], index: 4, kind: input, shape index: {}]   ;;  %s1928_s5 = inlined_call_operand.vmem [shape: f32[32,1], index: 5, kind: input, shape index: {}]   ;;  %s1929_s6 = inlined_call_operand.<no memory space> [shape: f32[1,1], index: 6, kind: input, shape index: {}]   ;;  %s1930_s7 = inlined_call_operand.hbm [shape: f32[1,128], index: 7, kind: output, shape index: {}]  }
   0x1   :  { %v12_v0 = vstv %s1929_s6 }
   0x2   :  { %13 = vst [vmem:[#allocation2] sm:$0x1] %v12_v0 }
   0x3   :  { %v29_v1 = vld [vmem:[%s1923_s0] sm:$0xff]  ;;  %v30_v2 = vld [vmem:[%s1923_s0 + $0x8] sm:$0xff]  ;;  %vm257_vm0 = vcmask 261120   ;;  %vm611_vm1 = vcmask 31744   ;;  %v31_v7 = vld [vmem:[%s1923_s0 + $0x10] sm:$0xff]  ;;  %v1386_v8 = vmov 0  }
   0x4   :  { %v45_v3 = vld [vmem:[%s1924_s1] sm:$0xff]  ;;  %v1262_v4 = vpack.c.bf16 %v30_v2, %v29_v1  ;;  %vm1442_vm2 = vmpackc.low %vm257_vm0, %vm257_vm0  ;;  %v46_v6 = vld [vmem:[%s1924_s1 + $0x8] sm:$0xff]  ;;  %1360 = vset.pattern.permute.xlu0 %v1386_v8  ;;  %1361 = vset.pattern.permute.xlu1 %v1386_v8 }
   0x5   :  { %v1310_v9 = vpack.c.bf16 %v46_v6, %v45_v3  ;;  %vm1454_vm3 = vmpackc.low %vm611_vm1, %vm611_vm1  ;;  %v32_v11 = vld [vmem:[%s1923_s0 + $0x18] sm:$0xff]  ;;  %v47_v12 = vld [vmem:[%s1924_s1 + $0x10] sm:$0xff] }
   0x6   :  { %1264 = vmatprep.subr.msk.bf16.mxu0 %vm1442_vm2, %v1262_v4  ;;  %v1268_v13 = vpack.c.bf16 %v32_v11, %v31_v7  ;;  %v48_v14 = vld [vmem:[%s1924_s1 + $0x18] sm:$0xff]  ;;  %v33_v16 = vld [vmem:[%s1923_s0 + $0x20] sm:$0xff]  ;;  %v34_v17 = vld [vmem:[%s1923_s0 + $0x28] sm:$0xff] }
   0x7   :  { %1267 = vmatpush3.bf16.xpose.msk.msra.mxu0 %vm1442_vm2, %v1262_v4  ;;  %1312 = vmatprep.subr.msk.bf16.mxu1 %vm1454_vm3, %v1310_v9  ;;  %v1316_v15 = vpack.c.bf16 %v48_v14, %v47_v12  ;;  %v49_v18 = vld [vmem:[%s1924_s1 + $0x20] sm:$0xff]  ;;  %v50_v19 = vld [vmem:[%s1924_s1 + $0x28] sm:$0xff]  ;;  %v1274_v20 = vpack.c.bf16 %v34_v17, %v33_v16  ;;  %v35_v24 = vld [vmem:[%s1923_s0 + $0x30] sm:$0xff] }
   0x8   :  { %1315 = vmatpush3.bf16.xpose.msk.msra.mxu1 %vm1454_vm3, %v1310_v9  ;;  %1270 = vmatprep.subr.msk.bf16.mxu0 %vm1442_vm2, %v1268_v13  ;;  %v1322_v21 = vpack.c.bf16 %v50_v19, %v49_v18  ;;  %v61_v22 = vld [vmem:[%s1925_s2] sm:$0xff]  ;;  %v36_v25 = vld [vmem:[%s1923_s0 + $0x38] sm:$0xff]  ;;  %v51_v26 = vld [vmem:[%s1924_s1 + $0x30] sm:$0xff] }
   0x9   :  { %1318 = vmatprep.subr.msk.bf16.mxu1 %vm1454_vm3, %v1316_v15  ;;  %1164 = vmatprep.mubr.msk.f32.mxu0 %vm257_vm0, %v61_v22  ;;  %v595_v23 = vld [vmem:[%s1926_s3] sm:$0xff]  ;;  %v52_v27 = vld [vmem:[%s1924_s1 + $0x38] sm:$0xff]  ;;  %v1280_v28 = vpack.c.bf16 %v36_v25, %v35_v24  ;;  %v90_v31 = vld [vmem:[%s1927_s4 + $0x8] sm:$0xff] }
   0xa   :  { %1238 = vmatprep.mubr.msk.f32.mxu1 %vm611_vm1, %v595_v23  ;;  %v89_v29 = vld [vmem:[%s1927_s4] sm:$0xff]  ;;  %v1328_v30 = vpack.c.bf16 %v52_v27, %v51_v26  ;;  %v91_v32 = vld [vmem:[%s1927_s4 + $0x10] sm:$0xff]  ;;  %v92_v33 = vld [vmem:[%s1927_s4 + $0x18] sm:$0xff] }
   0xb   :  { %119 = vperm.xlu0 %1360, %v89_v29   ;;  %129 = vperm.xlu1 %1361, %v91_v32   ;;  %v37_v34 = vld [vmem:[%s1923_s0 + $0x40] sm:$0xff]  ;;  %v38_v35 = vld [vmem:[%s1923_s0 + $0x48] sm:$0xff]  ;;  %v95_v42 = vld [vmem:[%s1927_s4 + $0x30] sm:$0xff] }
   0xc   :  { %v53_v36 = vld [vmem:[%s1924_s1 + $0x40] sm:$0xff]  ;;  %v54_v37 = vld [vmem:[%s1924_s1 + $0x48] sm:$0xff]  ;;  %v1286_v39 = vpack.c.bf16 %v38_v35, %v37_v34  ;;  %v96_v43 = vld [vmem:[%s1927_s4 + $0x38] sm:$0xff] }
   0xd   :  { %v93_v38 = vld [vmem:[%s1927_s4 + $0x20] sm:$0xff]  ;;  %v94_v40 = vld [vmem:[%s1927_s4 + $0x28] sm:$0xff]  ;;  %v1334_v41 = vpack.c.bf16 %v54_v37, %v53_v36  ;;  %v39_v44 = vld [vmem:[%s1923_s0 + $0x50] sm:$0xff] }
   0xe   :  { %v40_v45 = vld [vmem:[%s1923_s0 + $0x58] sm:$0xff]  ;;  %v55_v46 = vld [vmem:[%s1924_s1 + $0x50] sm:$0xff]  ;;  %v97_v48 = vld [vmem:[%s1927_s4 + $0x40] sm:$0xff] }
   0xf   :  { %1273 = vmatpush3.bf16.xpose.msk.msra.mxu0 %vm1442_vm2, %v1268_v13  ;;  %124 = vperm.xlu0 %1360, %v90_v31   ;;  %v56_v47 = vld [vmem:[%s1924_s1 + $0x58] sm:$0xff]  ;;  %v1292_v49 = vpack.c.bf16 %v40_v45, %v39_v44  ;;  %v98_v50 = vld [vmem:[%s1927_s4 + $0x48] sm:$0xff]  ;;  %v105_v52 = vld [vmem:[%s1927_s4 + $0x80] sm:$0xff] }
  0x10   :  { %1321 = vmatpush3.bf16.xpose.msk.msra.mxu1 %vm1454_vm3, %v1316_v15  ;;  %1276 = vmatprep.subr.msk.bf16.mxu0 %vm1442_vm2, %v1274_v20  ;;  %v1340_v51 = vpack.c.bf16 %v56_v47, %v55_v46  ;;  %v106_v53 = vld [vmem:[%s1927_s4 + $0x88] sm:$0xff] }
  0x11   :  { %1324 = vmatprep.subr.msk.bf16.mxu1 %vm1454_vm3, %v1322_v21  ;;  %134 = vperm.xlu1 %1361, %v92_v33  }
  0x13   :  { %139 = vperm.xlu0 %1360, %v93_v38  }
  0x15   :  { %144 = vperm.xlu1 %1361, %v94_v40  }
  0x17   :  { %1279 = vmatpush3.bf16.xpose.msk.msra.mxu0 %vm1442_vm2, %v1274_v20  ;;  %149 = vperm.xlu0 %1360, %v95_v42  }
  0x18   :  { %1327 = vmatpush3.bf16.xpose.msk.msra.mxu1 %vm1454_vm3, %v1322_v21  ;;  %1282 = vmatprep.subr.msk.bf16.mxu0 %vm1442_vm2, %v1280_v28 }
  0x19   :  { %1330 = vmatprep.subr.msk.bf16.mxu1 %vm1454_vm3, %v1328_v30  ;;  %154 = vperm.xlu1 %1361, %v96_v43  }
  0x1b   :  { %159 = vperm.xlu0 %1360, %v97_v48  }
  0x1d   :  { %164 = vperm.xlu1 %1361, %v98_v50  }
  0x1f   :  { %1285 = vmatpush3.bf16.xpose.msk.msra.mxu0 %vm1442_vm2, %v1280_v28 }
  0x20   :  { %1333 = vmatpush3.bf16.xpose.msk.msra.mxu1 %vm1454_vm3, %v1328_v30  ;;  %1288 = vmatprep.subr.msk.bf16.mxu0 %vm1442_vm2, %v1286_v39 }
  0x21   :  { %1336 = vmatprep.subr.msk.bf16.mxu1 %vm1454_vm3, %v1334_v41 }
  0x27   :  { %1291 = vmatpush3.bf16.xpose.msk.msra.mxu0 %vm1442_vm2, %v1286_v39 }
  0x28   :  { %1339 = vmatpush3.bf16.xpose.msk.msra.mxu1 %vm1454_vm3, %v1334_v41  ;;  %1294 = vmatprep.subr.msk.bf16.mxu0 %vm1442_vm2, %v1292_v49 }
  0x29   :  { %14 = vsyncpa [#allocation4], 0  ;;  %1342 = vmatprep.subr.msk.bf16.mxu1 %vm1454_vm3, %v1340_v51  ;;  %v41_v54 = vld [vmem:[%s1923_s0 + $0x60] sm:$0xff]  ;;  %v42_v55 = vld [vmem:[%s1923_s0 + $0x68] sm:$0xff]  ;;  %199 = vperm.xlu0 %1360, %v105_v52  }
  0x2a   :  { %v57_v56 = vld [vmem:[%s1924_s1 + $0x60] sm:$0xff]  ;;  %v58_v57 = vld [vmem:[%s1924_s1 + $0x68] sm:$0xff]  ;;  %v99_v58 = vld [vmem:[%s1927_s4 + $0x50] sm:$0xff]  ;;  %204 = vperm.xlu1 %1361, %v106_v53   ;;  %v1298_v59 = vpack.c.bf16 %v42_v55, %v41_v54 }
  0x2b   :  { %v101_v60 = vld [vmem:[%s1927_s4 + $0x60] sm:$0xff]  ;;  %v1346_v61 = vpack.c.bf16 %v58_v57, %v57_v56  ;;  %v102_v62 = vld [vmem:[%s1927_s4 + $0x68] sm:$0xff]  ;;  %v107_v63 = vld [vmem:[%s1927_s4 + $0x90] sm:$0xff] }
  0x2c   :  { %v43_v0 = vld [vmem:[%s1923_s0 + $0x70] sm:$0xff]  ;;  %v44_v1 = vld [vmem:[%s1923_s0 + $0x78] sm:$0xff]  ;;  %v109_v12 = vld [vmem:[%s1927_s4 + $0xa0] sm:$0xff] }
  0x2d   :  { %169 = vperm.xlu0 %1360, %v99_v58   ;;  %v59_v2 = vld [vmem:[%s1924_s1 + $0x70] sm:$0xff]  ;;  %v60_v3 = vld [vmem:[%s1924_s1 + $0x78] sm:$0xff]  ;;  %v1304_v6 = vpack.c.bf16 %v44_v1, %v43_v0  ;;  %v110_v13 = vld [vmem:[%s1927_s4 + $0xa8] sm:$0xff] }
  0x2e   :  { %179 = vperm.xlu1 %1361, %v101_v60   ;;  %v100_v4 = vld [vmem:[%s1927_s4 + $0x58] sm:$0xff]  ;;  %v103_v7 = vld [vmem:[%s1927_s4 + $0x70] sm:$0xff]  ;;  %v1352_v8 = vpack.c.bf16 %v60_v3, %v59_v2  ;;  %v113_v14 = vld [vmem:[%s1927_s4 + $0xc0] sm:$0xff] }
  0x2f   :  { %1297 = vmatpush3.bf16.xpose.msk.msra.mxu0 %vm1442_vm2, %v1292_v49  ;;  %v108_v9 = vld [vmem:[%s1927_s4 + $0x98] sm:$0xff]  ;;  %v114_v15 = vld [vmem:[%s1927_s4 + $0xc8] sm:$0xff]  ;;  %v111_v16 = vld [vmem:[%s1927_s4 + $0xb0] sm:$0xff] }
  0x30   :  { %1345 = vmatpush3.bf16.xpose.msk.msra.mxu1 %vm1454_vm3, %v1340_v51  ;;  %1300 = vmatprep.subr.msk.bf16.mxu0 %vm1442_vm2, %v1298_v59  ;;  %v104_v11 = vld [vmem:[%s1927_s4 + $0x78] sm:$0xff]  ;;  %v62_v17 = vld [vmem:[%s1925_s2 + $0x8] sm:$0xff]  ;;  %v63_v5 = vld [vmem:[%s1925_s2 + $0x10] sm:$0xff] }
  0x31   :  { %1348 = vmatprep.subr.msk.bf16.mxu1 %vm1454_vm3, %v1346_v61  ;;  %184 = vperm.xlu0 %1360, %v102_v62   ;;  %v596_v10 = vld [vmem:[%s1926_s3 + $0x8] sm:$0xff]  ;;  %v597_v18 = vld [vmem:[%s1926_s3 + $0x10] sm:$0xff]  ;;  %v112_v20 = vld [vmem:[%s1927_s4 + $0xb8] sm:$0xff] }
  0x32   :  { %209 = vperm.xlu1 %1361, %v107_v63   ;;  %v115_v19 = vld [vmem:[%s1927_s4 + $0xd0] sm:$0xff]  ;;  %v64_v21 = vld [vmem:[%s1925_s2 + $0x18] sm:$0xff]  ;;  %v65_v22 = vld [vmem:[%s1925_s2 + $0x20] sm:$0xff] }
  0x33   :  { %v598_v23 = vld [vmem:[%s1926_s3 + $0x18] sm:$0xff]  ;;  %v599_v24 = vld [vmem:[%s1926_s3 + $0x20] sm:$0xff]  ;;  %v66_v27 = vld [vmem:[%s1925_s2 + $0x28] sm:$0xff] }
  0x34   :  { %v116_v25 = vld [vmem:[%s1927_s4 + $0xd8] sm:$0xff]  ;;  %v913_v26 = vld [vmem:[%s1928_s5] sm:$0xff]  ;;  %v67_v28 = vld [vmem:[%s1925_s2 + $0x30] sm:$0xff] }
  0x35   :  { %174 = vperm.xlu0 %1360, %v100_v4   ;;  %v600_v29 = vld [vmem:[%s1926_s3 + $0x28] sm:$0xff]  ;;  %v601_v30 = vld [vmem:[%s1926_s3 + $0x30] sm:$0xff]  ;;  %v68_v33 = vld [vmem:[%s1925_s2 + $0x38] sm:$0xff] }
  0x36   :  { %189 = vperm.xlu1 %1361, %v103_v7   ;;  %v914_v31 = vld [vmem:[%s1928_s5 + $0x8] sm:$0xff]  ;;  %v915_v32 = vld [vmem:[%s1928_s5 + $0x10] sm:$0xff]  ;;  %v69_v34 = vld [vmem:[%s1925_s2 + $0x40] sm:$0xff] }
  0x37   :  { %1303 = vmatpush3.bf16.xpose.msk.msra.mxu0 %vm1442_vm2, %v1298_v59  ;;  %v602_v35 = vld [vmem:[%s1926_s3 + $0x38] sm:$0xff]  ;;  %v603_v36 = vld [vmem:[%s1926_s3 + $0x40] sm:$0xff]  ;;  %v70_v39 = vld [vmem:[%s1925_s2 + $0x48] sm:$0xff] }
  0x38   :  { %1351 = vmatpush3.bf16.xpose.msk.msra.mxu1 %vm1454_vm3, %v1346_v61  ;;  %1306 = vmatprep.subr.msk.bf16.mxu0 %vm1442_vm2, %v1304_v6  ;;  %v916_v37 = vld [vmem:[%s1928_s5 + $0x18] sm:$0xff]  ;;  %v954_v38 = vld [vmem:[#allocation2] sm:$0x1]  ;;  %v71_v40 = vld [vmem:[%s1925_s2 + $0x50] sm:$0xff] }
  0x39   :  { %1354 = vmatprep.subr.msk.bf16.mxu1 %vm1454_vm3, %v1352_v8  ;;  %214 = vperm.xlu0 %1360, %v108_v9   ;;  %v604_v41 = vld [vmem:[%s1926_s3 + $0x48] sm:$0xff]  ;;  %v605_v42 = vld [vmem:[%s1926_s3 + $0x50] sm:$0xff]  ;;  %v72_v43 = vld [vmem:[%s1925_s2 + $0x58] sm:$0xff] }
  0x3a   :  { %194 = vperm.xlu1 %1361, %v104_v11   ;;  %v73_v44 = vld [vmem:[%s1925_s2 + $0x60] sm:$0xff]  ;;  %v606_v45 = vld [vmem:[%s1926_s3 + $0x58] sm:$0xff]  ;;  %v74_v47 = vld [vmem:[%s1925_s2 + $0x68] sm:$0xff] }
  0x3b   :  { %v607_v46 = vld [vmem:[%s1926_s3 + $0x60] sm:$0xff]  ;;  %v75_v48 = vld [vmem:[%s1925_s2 + $0x70] sm:$0xff]  ;;  %v608_v49 = vld [vmem:[%s1926_s3 + $0x68] sm:$0xff] }
  0x3c   :  { %v609_v50 = vld [vmem:[%s1926_s3 + $0x70] sm:$0xff]  ;;  %v76_v51 = vld [vmem:[%s1925_s2 + $0x78] sm:$0xff]  ;;  %v77_v52 = vld [vmem:[%s1925_s2 + $0x80] sm:$0xff] }
  0x3d   :  { %219 = vperm.xlu0 %1360, %v109_v12   ;;  %v610_v53 = vld [vmem:[%s1926_s3 + $0x78] sm:$0xff]  ;;  %v78_v54 = vld [vmem:[%s1925_s2 + $0x88] sm:$0xff]  ;;  %v79_v55 = vld [vmem:[%s1925_s2 + $0x90] sm:$0xff] }
  0x3e   :  { %224 = vperm.xlu1 %1361, %v110_v13   ;;  %v80_v56 = vld [vmem:[%s1925_s2 + $0x98] sm:$0xff]  ;;  %v81_v57 = vld [vmem:[%s1925_s2 + $0xa0] sm:$0xff]  ;;  %v82_v58 = vld [vmem:[%s1925_s2 + $0xa8] sm:$0xff] }
  0x3f   :  { %1309 = vmatpush3.bf16.xpose.msk.msra.mxu0 %vm1442_vm2, %v1304_v6  ;;  %v83_v59 = vld [vmem:[%s1925_s2 + $0xb0] sm:$0xff]  ;;  %v84_v60 = vld [vmem:[%s1925_s2 + $0xb8] sm:$0xff]  ;;  %v85_v61 = vld [vmem:[%s1925_s2 + $0xc0] sm:$0xff] }
  0x40   :  { %1357 = vmatpush3.bf16.xpose.msk.msra.mxu1 %vm1454_vm3, %v1352_v8  ;;  %v86_v62 = vld [vmem:[%s1925_s2 + $0xc8] sm:$0xff]  ;;  %v87_v63 = vld [vmem:[%s1925_s2 + $0xd0] sm:$0xff]  ;;  %v88_v0 = vld [vmem:[%s1925_s2 + $0xd8] sm:$0xff]  ;;  %s1387_s2 = smov [#allocation3]  }
  0x41   :  { %239 = vperm.xlu0 %1360, %v113_v14   ;;  %s972_s1 = sshll.u32 %s1387_s2, 4  ;;  %s973_s1 = int_to_ptr.vmem [resolvable:$true] %s972_s1 }
  0x42   :  { %244 = vperm.xlu1 %1361, %v114_v15   ;;  %s1362_s11 = scalar_lea.vmem %s973_s1, 16  ;;  %s1366_s12 = scalar_lea.vmem %s973_s1, 32 }
  0x43   :  { %p1363_p0 = scmp.ne.s32.totalorder %s973_s1, %s1362_s11  ;;  %p1367_p1 = scmp.lt.s32.totalorder %s973_s1, %s973_s1 }
  0x44   :  { %p1368_p2 = scmp.lt.s32.totalorder %s1366_s12, %s1362_s11 }
  0x45   :  { %229 = vperm.xlu0 %1360, %v111_v16  }
  0x46   :  { %1165 = vmatmul.mubr.msk.f32.vlgmr.msra.gmra.mrb[0].mxu0 %vm257_vm0, %v62_v17  ;;  %249 = vperm.xlu1 %1361, %v115_v19   ;;  %p1369_p3 = por %p1368_p2, %p1367_p1 }
  0x47   :  { %1167 = vmatprep.mubr.msk.f32.mxu0 %vm257_vm0, %v63_v5  ;;  %1239 = vmatmul.mubr.msk.f32.vlgmr.msra.gmra.mrb[0].mxu1 %vm611_vm1, %v596_v10 }
  0x48   :  { %1241 = vmatprep.mubr.msk.f32.mxu1 %vm611_vm1, %v597_v18  ;;  %p1370_p4 = pnand %p1369_p3, %p1363_p0 }
  0x49   :  { %234 = vperm.xlu0 %1360, %v112_v20  }
  0x4a   :  { %1168 = vmatmul.mubr.msk.f32.gmra.mrb[2].mxu0 %vm257_vm0, %v64_v21  ;;  %254 = vperm.xlu1 %1361, %v116_v25  }
  0x4b   :  { %1170 = vmatprep.mubr.msk.f32.mxu0 %vm257_vm0, %v65_v22  ;;  %1242 = vmatmul.mubr.msk.f32.gmra.mrb[2].mxu1 %vm611_vm1, %v598_v23 }
  0x4c   :  { %1244 = vmatprep.mubr.msk.f32.mxu1 %vm611_vm1, %v599_v24 }
  0x4d   :  { %919 = vperm.xlu0 %1360, %v913_v26  }
  0x4e   :  { %1171 = vmatmul.mubr.msk.f32.gmra.mrb[4].mxu0 %vm257_vm0, %v66_v27  ;;  %924 = vperm.xlu1 %1361, %v914_v31  }
  0x4f   :  { %1173 = vmatprep.mubr.msk.f32.mxu0 %vm257_vm0, %v67_v28  ;;  %1245 = vmatmul.mubr.msk.f32.gmra.mrb[4].mxu1 %vm611_vm1, %v600_v29 }
  0x50   :  { %1247 = vmatprep.mubr.msk.f32.mxu1 %vm611_vm1, %v601_v30 }
  0x51   :  { %929 = vperm.xlu0 %1360, %v915_v32  }
  0x52   :  { %1174 = vmatmul.mubr.msk.f32.gmra.mrb[6].mxu0 %vm257_vm0, %v68_v33  ;;  %934 = vperm.xlu1 %1361, %v916_v37  }
  0x53   :  { %1176 = vmatprep.mubr.msk.f32.mxu0 %vm257_vm0, %v69_v34  ;;  %1248 = vmatmul.mubr.msk.f32.gmra.mrb[6].mxu1 %vm611_vm1, %v602_v35 }
  0x54   :  { %1250 = vmatprep.mubr.msk.f32.mxu1 %vm611_vm1, %v603_v36 }
  0x55   :  { %957 = vperm.xlu0 %1360, %v954_v38  }
  0x56   :  { %1177 = vmatmul.mubr.msk.f32.gmra.mrb[8].mxu0 %vm257_vm0, %v70_v39 }
  0x57   :  { %1179 = vmatprep.mubr.msk.f32.mxu0 %vm257_vm0, %v71_v40  ;;  %1251 = vmatmul.mubr.msk.f32.gmra.mrb[8].mxu1 %vm611_vm1, %v604_v41 }
  0x58   :  { %1253 = vmatprep.mubr.msk.f32.mxu1 %vm611_vm1, %v605_v42 }
  0x5a   :  { %1180 = vmatmul.mubr.msk.f32.gmra.mrb[10].mxu0 %vm257_vm0, %v72_v43 }
  0x5b   :  { %1182 = vmatprep.mubr.msk.f32.mxu0 %vm257_vm0, %v73_v44  ;;  %1254 = vmatmul.mubr.msk.f32.gmra.mrb[10].mxu1 %vm611_vm1, %v606_v45 }
  0x5c   :  { %1256 = vmatprep.mubr.msk.f32.mxu1 %vm611_vm1, %v607_v46 }
  0x5e   :  { %1183 = vmatmul.mubr.msk.f32.gmra.mrb[12].mxu0 %vm257_vm0, %v74_v47 }
  0x5f   :  { %1185 = vmatprep.mubr.msk.f32.mxu0 %vm257_vm0, %v75_v48  ;;  %1257 = vmatmul.mubr.msk.f32.gmra.mrb[12].mxu1 %vm611_vm1, %v608_v49 }
  0x60   :  { %1259 = vmatprep.mubr.msk.f32.mxu1 %vm611_vm1, %v609_v50 }
  0x62   :  { %1186 = vmatmul.mubr.msk.f32.gmra.mrb[14].mxu0 %vm257_vm0, %v76_v51 }
  0x63   :  { %1188 = vmatprep.mubr.msk.f32.mxu0 %vm257_vm0, %v77_v52  ;;  %1260 = vmatmul.mubr.msk.f32.gmra.mrb[14].mxu1 %vm611_vm1, %v610_v53 }
  0x66   :  { %1189 = vmatmul.mubr.msk.f32.gmra.mrb[16].mxu0 %vm257_vm0, %v78_v54 }
  0x67   :  { %1191 = vmatprep.mubr.msk.f32.mxu0 %vm257_vm0, %v79_v55 }
  0x6a   :  { %1192 = vmatmul.mubr.msk.f32.gmra.mrb[18].mxu0 %vm257_vm0, %v80_v56 }
  0x6b   :  { %1194 = vmatprep.mubr.msk.f32.mxu0 %vm257_vm0, %v81_v57 }
  0x6e   :  { %1195 = vmatmul.mubr.msk.f32.gmra.mrb[20].mxu0 %vm257_vm0, %v82_v58 }
  0x6f   :  { %1197 = vmatprep.mubr.msk.f32.mxu0 %vm257_vm0, %v83_v59 }
  0x72   :  { %1198 = vmatmul.mubr.msk.f32.gmra.mrb[22].mxu0 %vm257_vm0, %v84_v60 }
  0x73   :  { %1200 = vmatprep.mubr.msk.f32.mxu0 %vm257_vm0, %v85_v61 }
  0x76   :  { %1201 = vmatmul.mubr.msk.f32.gmra.mrb[24].mxu0 %vm257_vm0, %v86_v62 }
  0x77   :  { %1203 = vmatprep.mubr.msk.f32.mxu0 %vm257_vm0, %v87_v63 }
  0x7a   :  { %1204 = vmatmul.mubr.msk.f32.gmra.mrb[26].mxu0 %vm257_vm0, %v88_v0 }
  0x8a   :  { %v120_v1 = vpop.permute.xlu0 %119  ;;  %v130_v2 = vpop.permute.xlu1 %129 }
  0x8e   :  { %v125_v3 = vpop.permute.xlu0 %124 }
  0x90   :  { %v135_v4 = vpop.permute.xlu1 %134 }
  0x92   :  { %v140_v6 = vpop.permute.xlu0 %139 }
  0x94   :  { %v145_v7 = vpop.permute.xlu1 %144 }
  0x96   :  { %v150_v8 = vpop.permute.xlu0 %149 }
  0x98   :  { %v155_v9 = vpop.permute.xlu1 %154 }
  0x9a   :  { %v160_v11 = vpop.permute.xlu0 %159 }
  0x9c   :  { %v165_v12 = vpop.permute.xlu1 %164 }
  0xa8   :  { %v1875_v13 = vpop.permute.xlu0 %199 }
  0xa9   :  { %v1877_v14 = vpop.permute.xlu1 %204 }
  0xac   :  { %v170_v15 = vpop.permute.xlu0 %169 }
  0xad   :  { %v1879_v18 = vpop.permute.xlu1 %179 }
  0xb0   :  { %v185_v28 = vpop.permute.xlu0 %184 }
  0xb1   :  { %v1885_v33 = vpop.permute.xlu1 %209 }
  0xb4   :  { %v175_v44 = vpop.permute.xlu0 %174 }
  0xb5   :  { %v190_v51 = vpop.permute.xlu1 %189 }
  0xb8   :  { %v215_v62 = vpop.permute.xlu0 %214 }
 0x119   :  { %v1166_v16 = vpop.f32.mrb[0].mxu0 }
 0x11a   :  { %v462_v17 = vadd.f32 %v1166_v16, %v125_v3  ;;  %v456_v5 = vpop.f32.mrb[1].mxu0  ;;  %v1240_v10 = vpop.f32.mrb[0].mxu1 }
 0x11b   :  { %v457_v19 = vadd.f32 %v456_v5, %v120_v1  ;;  %v774_v20 = vpop.f32.mrb[1].mxu1  ;;  %v195_v3 = vpop.permute.xlu1 %194 }
 0x11c   :  { %v854_v21 = vand.u32 2147483647, %v462_v17 }
 0x11d   :  { %v853_v22 = vand.u32 2147483647, %v457_v19  ;;  %v1169_v23 = vpop.f32.mrb[2].mxu0  ;;  %v220_v19 = vpop.permute.xlu0 %219 }
 0x11e   :  { %v472_v24 = vadd.f32 %v1169_v23, %v135_v4  ;;  %v1881_v25 = vmul.f32 %v1240_v10, %v854_v21  ;;  %v466_v26 = vpop.f32.mrb[3].mxu0  ;;  %v1243_v27 = vpop.f32.mrb[2].mxu1 }
 0x11f   :  { %v467_v29 = vadd.f32 %v466_v26, %v130_v2  ;;  %v1883_v30 = vmul.f32 %v853_v22, %v774_v20  ;;  %v784_v31 = vpop.f32.mrb[3].mxu1  ;;  %v225_v26 = vpop.permute.xlu1 %224 }
 0x120   :  { %v856_v32 = vand.u32 2147483647, %v472_v24 }
 0x121   :  { %v855_v34 = vand.u32 2147483647, %v467_v29  ;;  %v1172_v35 = vpop.f32.mrb[4].mxu0 }
 0x122   :  { %v482_v36 = vadd.f32 %v1172_v35, %v145_v7  ;;  %v1887_v37 = vmul.f32 %v1243_v27, %v856_v32  ;;  %v476_v38 = vpop.f32.mrb[5].mxu0  ;;  %v1246_v39 = vpop.f32.mrb[4].mxu1 }
 0x123   :  { %v477_v40 = vadd.f32 %v476_v38, %v140_v6  ;;  %v1889_v41 = vmul.f32 %v855_v34, %v784_v31  ;;  %v794_v42 = vpop.f32.mrb[5].mxu1 }
 0x124   :  { %v858_v43 = vand.u32 2147483647, %v482_v36 }
 0x125   :  { %v857_v45 = vand.u32 2147483647, %v477_v40  ;;  %v1175_v46 = vpop.f32.mrb[6].mxu0 }
 0x126   :  { %v492_v47 = vadd.f32 %v1175_v46, %v155_v9  ;;  %v1891_v48 = vmul.f32 %v1246_v39, %v858_v43  ;;  %v486_v49 = vpop.f32.mrb[7].mxu0  ;;  %v1249_v50 = vpop.f32.mrb[6].mxu1 }
 0x127   :  { %v487_v52 = vadd.f32 %v486_v49, %v150_v8  ;;  %v1893_v53 = vmul.f32 %v857_v45, %v794_v42  ;;  %v804_v54 = vpop.f32.mrb[7].mxu1  ;;  %v245_v45 = vpop.permute.xlu1 %244 }
 0x128   :  { %v860_v55 = vand.u32 2147483647, %v492_v47 }
 0x129   :  { %v859_v56 = vand.u32 2147483647, %v487_v52  ;;  %v1178_v57 = vpop.f32.mrb[8].mxu0 }
 0x12a   :  { %v502_v58 = vadd.f32 %v1178_v57, %v165_v12  ;;  %v1895_v59 = vmul.f32 %v1249_v50, %v860_v55  ;;  %v496_v60 = vpop.f32.mrb[9].mxu0  ;;  %v1252_v61 = vpop.f32.mrb[8].mxu1 }
 0x12b   :  { %v497_v63 = vadd.f32 %v496_v60, %v160_v11  ;;  %v1897_v0 = vmul.f32 %v859_v56, %v804_v54  ;;  %v814_v1 = vpop.f32.mrb[9].mxu1 }
 0x12c   :  { %v862_v2 = vand.u32 2147483647, %v502_v58 }
 0x12d   :  { %v861_v4 = vand.u32 2147483647, %v497_v63  ;;  %v1181_v6 = vpop.f32.mrb[10].mxu0  ;;  %v250_v63 = vpop.permute.xlu1 %249 }
 0x12e   :  { %v512_v7 = vadd.f32 %v1181_v6, %v175_v44  ;;  %v886_v8 = vmul.f32 %v1252_v61, %v862_v2  ;;  %v506_v9 = vpop.f32.mrb[11].mxu0  ;;  %v1255_v16 = vpop.f32.mrb[10].mxu1 }
 0x12f   :  { %v507_v17 = vadd.f32 %v506_v9, %v170_v15  ;;  %v885_v5 = vmul.f32 %v861_v4, %v814_v1  ;;  %v824_v12 = vpop.f32.mrb[11].mxu1  ;;  %v240_v44 = vpop.permute.xlu0 %239 }
 0x130   :  { %v864_v10 = vand.u32 2147483647, %v512_v7 }
 0x131   :  { %v863_v20 = vand.u32 2147483647, %v507_v17  ;;  %v1184_v21 = vpop.f32.mrb[12].mxu0 }
 0x132   :  { %v522_v22 = vadd.f32 %v1184_v21, %v185_v28  ;;  %v888_v11 = vmul.f32 %v1255_v16, %v864_v10  ;;  %v516_v23 = vpop.f32.mrb[13].mxu0  ;;  %v1258_v24 = vpop.f32.mrb[12].mxu1 }
 0x133   :  { %v517_v27 = vadd.f32 %v516_v23, %v1879_v18  ;;  %v887_v29 = vmul.f32 %v863_v20, %v824_v12  ;;  %v834_v31 = vpop.f32.mrb[13].mxu1 }
 0x134   :  { %v866_v32 = vand.u32 2147483647, %v522_v22 }
 0x135   :  { %v865_v34 = vand.u32 2147483647, %v517_v27  ;;  %v1187_v35 = vpop.f32.mrb[14].mxu0 }
 0x136   :  { %v532_v36 = vadd.f32 %v1187_v35, %v195_v3  ;;  %v890_v15 = vmul.f32 %v1258_v24, %v866_v32  ;;  %v526_v38 = vpop.f32.mrb[15].mxu0  ;;  %v1261_v39 = vpop.f32.mrb[14].mxu1 }
 0x137   :  { %v527_v40 = vadd.f32 %v526_v38, %v190_v51  ;;  %v889_v42 = vmul.f32 %v865_v34, %v834_v31  ;;  %v844_v43 = vpop.f32.mrb[15].mxu1  ;;  %v230_v51 = vpop.permute.xlu0 %229 }
 0x138   :  { %v868_v28 = vand.u32 2147483647, %v532_v36 }
 0x139   :  { %v867_v46 = vand.u32 2147483647, %v527_v40  ;;  %v1190_v47 = vpop.f32.mrb[16].mxu0 }
 0x13a   :  { %v542_v49 = vadd.f32 %v1190_v47, %v1877_v14  ;;  %v892_v18 = vmul.f32 %v1261_v39, %v868_v28  ;;  %v536_v50 = vpop.f32.mrb[17].mxu0 }
 0x13b   :  { %v537_v52 = vadd.f32 %v536_v50, %v1875_v13  ;;  %v891_v54 = vmul.f32 %v867_v46, %v844_v43  ;;  %v235_v17 = vpop.permute.xlu0 %234 }
 0x13c   :  { %v894_v55 = vadd.f32 %v1881_v25, %v542_v49 }
 0x13d   :  { %v893_v56 = vadd.f32 %v1883_v30, %v537_v52  ;;  %v1193_v57 = vpop.f32.mrb[18].mxu0 }
 0x13e   :  { %v898_v58 = vadd.f32 %v894_v55, %v1891_v48  ;;  %v552_v60 = vadd.f32 %v1193_v57, %v215_v62  ;;  %v546_v61 = vpop.f32.mrb[19].mxu0  ;;  %v960_v57 = vlaneseq }
 0x13f   :  { %v897_v1 = vadd.f32 %v893_v56, %v1893_v53  ;;  %v547_v14 = vadd.f32 %v546_v61, %v1885_v33  ;;  %v255_v33 = vpop.permute.xlu1 %254  ;;  %v920_v35 = vpop.permute.xlu0 %919 }
 0x140   :  { %v902_v2 = vadd.f32 %v898_v58, %v886_v8  ;;  %v896_v3 = vadd.f32 %v1887_v37, %v552_v60  ;;  %v961_v60 = vshrl.u32 %v960_v57, 7 }
 0x141   :  { %v901_v13 = vadd.f32 %v897_v1, %v885_v5  ;;  %v895_v4 = vadd.f32 %v1889_v41, %v547_v14  ;;  %v1196_v25 = vpop.f32.mrb[20].mxu0 }
 0x142   :  { %v900_v30 = vadd.f32 %v896_v3, %v1895_v59  ;;  %v562_v6 = vadd.f32 %v1196_v25, %v225_v26  ;;  %v906_v7 = vadd.f32 %v902_v2, %v890_v15  ;;  %v556_v9 = vpop.f32.mrb[21].mxu0  ;;  %v962_v14 = vsub.s32 0, %v961_v60 }
 0x143   :  { %v899_v48 = vadd.f32 %v895_v4, %v1897_v0  ;;  %v557_v62 = vadd.f32 %v556_v9, %v220_v19  ;;  %v905_v16 = vadd.f32 %v901_v13, %v889_v42  ;;  %v925_v32 = vpop.permute.xlu1 %924  ;;  %v930_v50 = vpop.permute.xlu0 %929 }
 0x144   :  { %v904_v53 = vadd.f32 %v900_v30, %v888_v11  ;;  %v870_v12 = vand.u32 2147483647, %v562_v6 }
 0x145   :  { %v903_v8 = vadd.f32 %v899_v48, %v887_v29  ;;  %v869_v10 = vand.u32 2147483647, %v557_v62  ;;  %v1199_v37 = vpop.f32.mrb[22].mxu0 }
 0x146   :  { %v910_v5 = vmul.f32 %v906_v7, %v870_v12  ;;  %v572_v20 = vadd.f32 %v1199_v37, %v235_v17  ;;  %v908_v41 = vadd.f32 %v904_v53, %v892_v18  ;;  %v566_v21 = vpop.f32.mrb[23].mxu0 }
 0x147   :  { %v909_v22 = vmul.f32 %v905_v16, %v869_v10  ;;  %v567_v59 = vadd.f32 %v566_v21, %v230_v51  ;;  %v907_v23 = vadd.f32 %v903_v8, %v891_v54  ;;  %v935_v47 = vpop.permute.xlu1 %934  ;;  %v958_v2 = vpop.permute.xlu0 %957 }
 0x148   :  { %v872_v24 = vand.u32 2147483647, %v572_v20  ;;  %v963_v13 = vrot.slane %v958_v2, %v962_v14 }
 0x149   :  { %v871_v26 = vand.u32 2147483647, %v567_v59  ;;  %v1202_v27 = vpop.f32.mrb[24].mxu0 }
 0x14a   :  { %v912_v0 = vmul.f32 %v908_v41, %v872_v24  ;;  %v582_v19 = vadd.f32 %v1202_v27, %v245_v45  ;;  %v576_v31 = vpop.f32.mrb[25].mxu0 }
 0x14b   :  { %v911_v11 = vmul.f32 %v907_v23, %v871_v26  ;;  %v577_v34 = vadd.f32 %v576_v31, %v240_v44 }
 0x14c   :  { %v874_v29 = vmax.f32 %v582_v19, 0.0 }
 0x14d   :  { %v873_v36 = vmax.f32 %v577_v34, 0.0  ;;  %v1205_v15 = vpop.f32.mrb[26].mxu0 }
 0x14e   :  { %v938_v38 = vmul.f32 %v925_v32, %v874_v29  ;;  %v592_v39 = vadd.f32 %v1205_v15, %v255_v33  ;;  %v586_v40 = vpop.f32.mrb[27].mxu0 }
 0x14f   :  { %v937_v42 = vmul.f32 %v920_v35, %v873_v36  ;;  %v587_v43 = vadd.f32 %v586_v40, %v250_v63 }
 0x150   :  { %v942_v28 = vadd.f32 %v938_v38, %v910_v5  ;;  %v876_v46 = vmax.f32 %v592_v39, 0.0 }
 0x151   :  { %v941_v49 = vadd.f32 %v937_v42, %v909_v22  ;;  %v875_v18 = vmax.f32 %v587_v43, 0.0 }
 0x152   :  { %v940_v45 = vmul.f32 %v935_v47, %v876_v46 }
 0x153   :  { %v945_v52 = vadd.f32 %v942_v28, %v941_v49  ;;  %v939_v54 = vmul.f32 %v930_v50, %v875_v18 }
 0x154   :  { %v944_v55 = vadd.f32 %v940_v45, %v912_v0 }
 0x155   :  { %v943_v44 = vadd.f32 %v939_v54, %v911_v11 }
 0x157   :  { %v946_v56 = vadd.f32 %v945_v52, %v943_v44 }
 0x159   :  { %v947_v51 = vadd.f32 %v946_v56, %v944_v55 }
 0x15b   :  { %v948_v58 = vrot.slane %v947_v51, 4 }
 0x15d   :  { %v949_v61 = vadd.f32 %v948_v58, %v947_v51 }
 0x15f   :  { %v950_v1 = vrot.slane %v949_v61, 2 }
 0x161   :  { %v951_v63 = vadd.f32 %v950_v1, %v949_v61 }
 0x163   :  { %v952_v3 = vrot.slane %v951_v63, 1 }
 0x165   :  { %v953_v4 = vadd.f32 %v952_v3, %v951_v63 }
 0x167   :  { %v964_v25 = vadd.f32 %v963_v13, %v953_v4 }
 0x169   :  { %965 = vst [vmem:[#allocation3] sm:$0x1] %v964_v25 }
 0x16a   :  { %1373 = shalt.err (!%p1370_p4)
}
 0x16b   :  { %s1374_s15 = scalar_lea.hbm %s1930_s7, 16 }
 0x16c   :  { %p1375_p5 = scmp.ne.s32.totalorder %s1930_s7, %s1374_s15  ;;  %p1378_p6 = scmp.lt.u32.totalorder %s1374_s15, %s1930_s7 }
 0x16e   :  { %p1380_p7 = pnand %p1378_p6, %p1375_p5 }
 0x170   :  { %1383 = shalt.err (!%p1380_p7)
}
 0x171   :  { %975 = dma.vmem_to_hbm [thread:$0]  %s973_s1, 16, %s1930_s7, [#allocation4]  }
 0x172   :  { %1384 = dma.done.wait [#allocation4], 16  }
 0x173   :  { %1385 = vsyncadd [#allocation4], 4294967280 }
 0x174   :  { %979 = vsyncpa [#allocation4], 1 }

</bundles_post_ra>
